<compile_context>
chip_gen: v7x
topology: tpu7x:2x2x1
jax: 0.10.0
libtpu: 0.0.40
codegen_flags: <defaults>
</compile_context>

<pallas_src>
import functools

import jax
import jax.numpy as jnp
from jax.experimental import pallas as pl
from jax.experimental.pallas import tpu as pltpu


_VMEM_LIMIT = 48 * 1024 * 1024


def _cparams():
    return pltpu.CompilerParams(dimension_semantics=("parallel",),
                                vmem_limit_bytes=_VMEM_LIMIT)


# ----------------------------------------------------------------------------
# Pallas kernels
# ----------------------------------------------------------------------------

def _conv_taps(x_ref, w_ref, Kq, L_out):
    """Sum_q dot(x[q:q+L_out, :], w[q]) with f32 accumulation (MXU)."""
    acc = jnp.dot(x_ref[0, pl.ds(0, L_out), :], w_ref[0],
                  preferred_element_type=jnp.float32)
    for q in range(1, Kq):
        acc = acc + jnp.dot(x_ref[0, pl.ds(q, L_out), :], w_ref[q],
                            preferred_element_type=jnp.float32)
    return acc


def _conv_bn_kernel(x_ref, w_ref, shift_ref, o_ref, *, Kq, L_out, relu):
    """Conv (BN scale folded into weights) + shift (+ReLU)."""
    y = _conv_taps(x_ref, w_ref, Kq, L_out) + shift_ref[...]
    if relu:
        y = jnp.maximum(y, 0.0)
    o_ref[0] = y.astype(o_ref.dtype)


def _conv_bn_res_kernel(x_ref, res_ref, w_ref, shift_ref, o_ref, *, Kq, L_out):
    """Conv + shift + residual add + ReLU (fused BasicBlock tail)."""
    y = _conv_taps(x_ref, w_ref, Kq, L_out) + shift_ref[...]
    y = y + res_ref[0].astype(jnp.float32)
    o_ref[0] = jnp.maximum(y, 0.0).astype(o_ref.dtype)


def _conv_bn_down_kernel(x_ref, w_ref, shift_ref, wd_ref, shiftd_ref,
                         o_ref, r_ref, *, Kq, L_out, q0):
    """Block's first conv (+ReLU) fused with the 1x1 downsample conv (shared input)."""
    y = _conv_taps(x_ref, w_ref, Kq, L_out) + shift_ref[...]
    o_ref[0] = jnp.maximum(y, 0.0).astype(o_ref.dtype)
    r = jnp.dot(x_ref[0, pl.ds(q0, L_out), :], wd_ref[...],
                preferred_element_type=jnp.float32) + shiftd_ref[...]
    r_ref[0] = r.astype(r_ref.dtype)


def _maxpool_kernel(xe_ref, xo_ref, o_ref, *, L_out):
    """MaxPool1d(kernel=3, stride=2, padding=1) from even/odd phase views."""
    m = jnp.maximum(xe_ref[0, pl.ds(0, L_out), :], xo_ref[0, pl.ds(0, L_out), :])
    o_ref[0] = jnp.maximum(m, xe_ref[0, pl.ds(1, L_out), :])


def _pool_fc_kernel(x_ref, w_ref, b_ref, o_ref, *, C):
    """AdaptiveAvgPool1d(1) ++ AdaptiveMaxPool1d(1) -> concat -> Linear, fused."""
    x = x_ref[0].astype(jnp.float32)                    # (L, C)
    avg = jnp.mean(x, axis=0, keepdims=True)            # (1, C)
    mx = jnp.max(x, axis=0, keepdims=True)              # (1, C)
    o = (jnp.dot(avg, w_ref[pl.ds(0, C), :], preferred_element_type=jnp.float32)
         + jnp.dot(mx, w_ref[pl.ds(C, C), :], preferred_element_type=jnp.float32)
         + b_ref[...])
    o_ref[0] = o


# ----------------------------------------------------------------------------
# Wrappers (padding / phase packing glue is cheap XLA; all math is in kernels)
# ----------------------------------------------------------------------------

def conv_bn(x, w_packed, shift, *, k, stride, padding, relu=True,
            residual=None, down=None):
    """Conv1d(bias=False) + folded BN (+ReLU / +residual / +fused downsample).

    x:        (N, L, Cin) bf16
    w_packed: (Kq, stride*Cin, Cout) bf16 (BN scale folded, phase-packed)
    shift:    (1, Cout) f32
    """
    N, L, Cin = x.shape
    Kq, Cw, Cout = w_packed.shape
    L_out = (L + 2 * padding - k) // stride + 1
    Lph = L_out + Kq - 1
    right = stride * Lph - L - padding
    assert right >= 0 and Cw == stride * Cin
    x_pad = jnp.pad(x, ((0, 0), (padding, right), (0, 0)))
    if stride > 1:
        x_pad = x_pad.reshape(N, Lph, stride * Cin)

    x_spec = pl.BlockSpec((1, Lph, Cw), lambda n: (n, 0, 0))
    w_spec = pl.BlockSpec((Kq, Cw, Cout), lambda n: (0, 0, 0))
    s_spec = pl.BlockSpec((1, Cout), lambda n: (0, 0))
    o_spec = pl.BlockSpec((1, L_out, Cout), lambda n: (n, 0, 0))
    o_sds = jax.ShapeDtypeStruct((N, L_out, Cout), jnp.bfloat16)

    if down is not None:
        wd, shiftd = down
        q0 = padding // stride
        kern = functools.partial(_conv_bn_down_kernel, Kq=Kq, L_out=L_out, q0=q0)
        out, res = pl.pallas_call(
            kern,
            out_shape=(o_sds, o_sds),
            grid=(N,),
            in_specs=[x_spec, w_spec, s_spec,
                      pl.BlockSpec((Cw, Cout), lambda n: (0, 0)), s_spec],
            out_specs=(o_spec, o_spec),
            compiler_params=_cparams(),
        )(x_pad, w_packed, shift, wd, shiftd)
        return out, res

    if residual is not None:
        kern = functools.partial(_conv_bn_res_kernel, Kq=Kq, L_out=L_out)
        return pl.pallas_call(
            kern,
            out_shape=o_sds,
            grid=(N,),
            in_specs=[x_spec, o_spec, w_spec, s_spec],
            out_specs=o_spec,
            compiler_params=_cparams(),
        )(x_pad, residual, w_packed, shift)

    kern = functools.partial(_conv_bn_kernel, Kq=Kq, L_out=L_out, relu=relu)
    return pl.pallas_call(
        kern,
        out_shape=o_sds,
        grid=(N,),
        in_specs=[x_spec, w_spec, s_spec],
        out_specs=o_spec,
        compiler_params=_cparams(),
    )(x_pad, w_packed, shift)


def maxpool1d_k3s2p1(x):
    """MaxPool1d(kernel_size=3, stride=2, padding=1), computed strided in-kernel."""
    N, L, C = x.shape
    L_out = (L + 2 - 3) // 2 + 1
    x_pad = jnp.pad(x, ((0, 0), (1, 1), (0, 0)), constant_values=-jnp.inf)
    x_even = x_pad[:, 0::2, :]
    x_odd = x_pad[:, 1::2, :]
    Le, Lo = x_even.shape[1], x_odd.shape[1]
    return pl.pallas_call(
        functools.partial(_maxpool_kernel, L_out=L_out),
        out_shape=jax.ShapeDtypeStruct((N, L_out, C), jnp.bfloat16),
        grid=(N,),
        in_specs=[pl.BlockSpec((1, Le, C), lambda n: (n, 0, 0)),
                  pl.BlockSpec((1, Lo, C), lambda n: (n, 0, 0))],
        out_specs=pl.BlockSpec((1, L_out, C), lambda n: (n, 0, 0)),
        compiler_params=_cparams(),
    )(x_even, x_odd)


def pool_concat_fc(x, w, b):
    """Fused adaptive avg/max pool (to 1) + concat + Linear."""
    N, L, C = x.shape
    ncls = w.shape[1]
    out = pl.pallas_call(
        functools.partial(_pool_fc_kernel, C=C),
        out_shape=jax.ShapeDtypeStruct((N, 1, ncls), jnp.float32),
        grid=(N,),
        in_specs=[pl.BlockSpec((1, L, C), lambda n: (n, 0, 0)),
                  pl.BlockSpec((2 * C, ncls), lambda n: (0, 0)),
                  pl.BlockSpec((1, ncls), lambda n: (0, 0))],
        out_specs=pl.BlockSpec((1, 1, ncls), lambda n: (n, 0, 0)),
        compiler_params=_cparams(),
    )(x, w, b.reshape(1, ncls))
    return out.reshape(N, ncls)


# ----------------------------------------------------------------------------
# Parameter init (deterministic, synthetic), BN folding and weight packing
# ----------------------------------------------------------------------------

def _conv_w(key, cin, cout, k):
    # stored as (K, Cin, Cout)
    return jax.random.normal(key, (k, cin, cout), jnp.float32) / jnp.sqrt(cin * k)


def _bn(key, c, eps=1e-5):
    k1, k2, k3, k4 = jax.random.split(key, 4)
    gamma = 1.0 + 0.1 * jax.random.normal(k1, (c,), jnp.float32)
    beta = 0.1 * jax.random.normal(k2, (c,), jnp.float32)
    mean = 0.1 * jax.random.normal(k3, (c,), jnp.float32)
    var = 1.0 + 0.5 * jax.random.uniform(k4, (c,), jnp.float32)
    scale = gamma / jnp.sqrt(var + eps)
    shift = beta - mean * scale
    return scale, shift


def _pack_conv(w, scale, stride):
    """(K, Cin, Cout) f32 -> phase-packed (ceil(K/s), s*Cin, Cout) bf16, scale folded."""
    K, Cin, Cout = w.shape
    w = w * scale[None, None, :]
    Kq = -(-K // stride)
    wp = jnp.zeros((Kq * stride, Cin, Cout), jnp.float32).at[:K].set(w)
    wp = wp.reshape(Kq, stride, Cin, Cout).reshape(Kq, stride * Cin, Cout)
    return wp.astype(jnp.bfloat16)


def _pack_down(wd, scale, stride, phase):
    """1x1 downsample (1, Cin, Cout) -> (s*Cin, Cout) bf16 living at `phase`."""
    _, Cin, Cout = wd.shape
    w = wd[0] * scale[None, :]
    wp = jnp.zeros((stride, Cin, Cout), jnp.float32).at[phase].set(w)
    return wp.reshape(stride * Cin, Cout).astype(jnp.bfloat16)


def init_params(key, layers=(1, 1, 1, 1), input_channels=12, inplanes=64,
                num_classes=9):
    keys = iter(jax.random.split(key, 256))
    p = {}
    w = _conv_w(next(keys), input_channels, inplanes, 15)
    sc, sh = _bn(next(keys), inplanes)
    p["stem"] = dict(w=_pack_conv(w, sc, 2), shift=sh.reshape(1, -1),
                     k=15, stride=2, pad=7)
    cur = inplanes
    stages = []
    for planes, nblocks, stride in zip((64, 128, 256, 512), layers, (1, 2, 2, 2)):
        blocks = []
        for bidx in range(nblocks):
            s = stride if bidx == 0 else 1
            need_down = (bidx == 0) and (s != 1 or cur != planes)
            w1 = _conv_w(next(keys), cur, planes, 7)
            sc1, sh1 = _bn(next(keys), planes)
            w2 = _conv_w(next(keys), planes, planes, 7)
            sc2, sh2 = _bn(next(keys), planes)
            blk = dict(stride=s, k=7, pad=3,
                       w1=_pack_conv(w1, sc1, s), shift1=sh1.reshape(1, -1),
                       w2=_pack_conv(w2, sc2, 1), shift2=sh2.reshape(1, -1),
                       down=None)
            if need_down:
                wd = _conv_w(next(keys), cur, planes, 1)
                scd, shd = _bn(next(keys), planes)
                blk["down"] = (_pack_down(wd, scd, s, phase=3 % s),
                               shd.reshape(1, -1))
            blocks.append(blk)
            cur = planes
        stages.append(blocks)
    p["stages"] = stages
    p["fc_w"] = jax.random.normal(next(keys), (cur * 2, num_classes),
                                  jnp.float32) / jnp.sqrt(cur * 2)
    p["fc_b"] = 0.01 * jax.random.normal(next(keys), (num_classes,), jnp.float32)
    return p


# ----------------------------------------------------------------------------
# Model forward
# ----------------------------------------------------------------------------

def basic_block(x, blk):
    s = blk["stride"]
    if blk["down"] is not None:
        out, residual = conv_bn(x, blk["w1"], blk["shift1"], k=blk["k"],
                                stride=s, padding=blk["pad"], down=blk["down"])
    else:
        out = conv_bn(x, blk["w1"], blk["shift1"], k=blk["k"],
                      stride=s, padding=blk["pad"], relu=True)
        residual = x
    # Dropout(p=0.2): identity in eval mode.
    out = conv_bn(out, blk["w2"], blk["shift2"], k=blk["k"], stride=1,
                  padding=blk["pad"], residual=residual)
    return out


def forward(params, x_ncl):
    # torch (N, C, L) -> kernel layout (N, L, C), bf16 for MXU feeds
    x = jnp.transpose(x_ncl, (0, 2, 1)).astype(jnp.bfloat16)
    st = params["stem"]
    x = conv_bn(x, st["w"], st["shift"], k=st["k"], stride=st["stride"],
                padding=st["pad"], relu=True)
    x = maxpool1d_k3s2p1(x)
    for blocks in params["stages"]:
        for blk in blocks:
            x = basic_block(x, blk)
    return pool_concat_fc(x, params["fc_w"], params["fc_b"])   # (N, num_classes) f32


if __name__ == "__main__":
    key = jax.random.PRNGKey(0)
    pkey, xkey = jax.random.split(key)

    # ResNet1d(BasicBlock1d, layers=[1,1,1,1], input_channels=12, num_classes=9)
    params = init_params(pkey, layers=(1, 1, 1, 1), input_channels=12,
                         inplanes=64, num_classes=9)

    N, C_IN, L = 2, 12, 64                         # small torch-style (N, C, L) input
    x = jax.random.normal(xkey, (N, C_IN, L), jnp.float32)

    out = forward(params, x)
    out = jax.block_until_ready(out)
    assert out.shape == (N, 9), out.shape
    assert bool(jnp.all(jnp.isfinite(out)))
    print("KERNEL_OK")
</pallas_src>

<mosaic_0001>
module attributes {stable_mosaic.version = 11 : i64} {
  func.func @_conv_bn_kernel(%arg0: i32, %arg1: memref<1x39x24xbf16, #tpu.memory_space<vmem>>, %arg2: memref<8x24x64xbf16, #tpu.memory_space<vmem>>, %arg3: memref<1x64xf32, #tpu.memory_space<vmem>>, %arg4: memref<1x32x64xbf16, #tpu.memory_space<vmem>>) attributes {dimension_semantics = [#tpu.dimension_semantics<parallel>], iteration_bounds = array<i64: 2>, scalar_prefetch = 0 : i64, scratch_operands = 0 : i64, tpu.core_type = #tpu.core_type<tc>, window_params = [{transform_indices = @transform_0, window_bounds = array<i64: 1, 39, 24>}, {pipeline_mode = #tpu.pipeline_mode<synchronous>, transform_indices = @transform_1, window_bounds = array<i64: 8, 24, 64>}, {pipeline_mode = #tpu.pipeline_mode<synchronous>, transform_indices = @transform_2, window_bounds = array<i64: 1, 64>}, {transform_indices = @transform_3, window_bounds = array<i64: 1, 32, 64>}]} {
    %c0 = arith.constant 0 : index
    %c0_0 = arith.constant 0 : index
    %c0_1 = arith.constant 0 : index
    %0 = vector.load %arg1[%c0, %c0_0, %c0_1] : memref<1x39x24xbf16, #tpu.memory_space<vmem>>, vector<1x32x24xbf16>
    %1 = vector.shape_cast %0 : vector<1x32x24xbf16> to vector<32x24xbf16>
    %c0_2 = arith.constant 0 : index
    %c0_3 = arith.constant 0 : index
    %c0_4 = arith.constant 0 : index
    %2 = vector.load %arg2[%c0_2, %c0_3, %c0_4] : memref<8x24x64xbf16, #tpu.memory_space<vmem>>, vector<1x24x64xbf16>
    %3 = vector.shape_cast %2 : vector<1x24x64xbf16> to vector<24x64xbf16>
    %cst = arith.constant dense<0.000000e+00> : vector<32x64xf32>
    %4 = tpu.matmul %1, %3, %cst {dimension_numbers = #tpu.dot_dimension_numbers<[1], [0], [0], [1], [0, 0, 1, 1], [], []>} : vector<32x24xbf16>, vector<24x64xbf16>, vector<32x64xf32> -> vector<32x64xf32>
    %c0_5 = arith.constant 0 : index
    %c1 = arith.constant 1 : index
    %c0_6 = arith.constant 0 : index
    %5 = vector.load %arg1[%c0_5, %c1, %c0_6] : memref<1x39x24xbf16, #tpu.memory_space<vmem>>, vector<1x32x24xbf16>
    %6 = vector.shape_cast %5 : vector<1x32x24xbf16> to vector<32x24xbf16>
    %c1_7 = arith.constant 1 : index
    %c0_8 = arith.constant 0 : index
    %c0_9 = arith.constant 0 : index
    %7 = vector.load %arg2[%c1_7, %c0_8, %c0_9] : memref<8x24x64xbf16, #tpu.memory_space<vmem>>, vector<1x24x64xbf16>
    %8 = vector.shape_cast %7 : vector<1x24x64xbf16> to vector<24x64xbf16>
    %cst_10 = arith.constant dense<0.000000e+00> : vector<32x64xf32>
    %9 = tpu.matmul %6, %8, %cst_10 {dimension_numbers = #tpu.dot_dimension_numbers<[1], [0], [0], [1], [0, 0, 1, 1], [], []>} : vector<32x24xbf16>, vector<24x64xbf16>, vector<32x64xf32> -> vector<32x64xf32>
    %10 = arith.addf %4, %9 : vector<32x64xf32>
    %c0_11 = arith.constant 0 : index
    %c2 = arith.constant 2 : index
    %c0_12 = arith.constant 0 : index
    %11 = vector.load %arg1[%c0_11, %c2, %c0_12] : memref<1x39x24xbf16, #tpu.memory_space<vmem>>, vector<1x32x24xbf16>
    %12 = vector.shape_cast %11 : vector<1x32x24xbf16> to vector<32x24xbf16>
    %c2_13 = arith.constant 2 : index
    %c0_14 = arith.constant 0 : index
    %c0_15 = arith.constant 0 : index
    %13 = vector.load %arg2[%c2_13, %c0_14, %c0_15] : memref<8x24x64xbf16, #tpu.memory_space<vmem>>, vector<1x24x64xbf16>
    %14 = vector.shape_cast %13 : vector<1x24x64xbf16> to vector<24x64xbf16>
    %cst_16 = arith.constant dense<0.000000e+00> : vector<32x64xf32>
    %15 = tpu.matmul %12, %14, %cst_16 {dimension_numbers = #tpu.dot_dimension_numbers<[1], [0], [0], [1], [0, 0, 1, 1], [], []>} : vector<32x24xbf16>, vector<24x64xbf16>, vector<32x64xf32> -> vector<32x64xf32>
    %16 = arith.addf %10, %15 : vector<32x64xf32>
    %c0_17 = arith.constant 0 : index
    %c3 = arith.constant 3 : index
    %c0_18 = arith.constant 0 : index
    %17 = vector.load %arg1[%c0_17, %c3, %c0_18] : memref<1x39x24xbf16, #tpu.memory_space<vmem>>, vector<1x32x24xbf16>
    %18 = vector.shape_cast %17 : vector<1x32x24xbf16> to vector<32x24xbf16>
    %c3_19 = arith.constant 3 : index
    %c0_20 = arith.constant 0 : index
    %c0_21 = arith.constant 0 : index
    %19 = vector.load %arg2[%c3_19, %c0_20, %c0_21] : memref<8x24x64xbf16, #tpu.memory_space<vmem>>, vector<1x24x64xbf16>
    %20 = vector.shape_cast %19 : vector<1x24x64xbf16> to vector<24x64xbf16>
    %cst_22 = arith.constant dense<0.000000e+00> : vector<32x64xf32>
    %21 = tpu.matmul %18, %20, %cst_22 {dimension_numbers = #tpu.dot_dimension_numbers<[1], [0], [0], [1], [0, 0, 1, 1], [], []>} : vector<32x24xbf16>, vector<24x64xbf16>, vector<32x64xf32> -> vector<32x64xf32>
    %22 = arith.addf %16, %21 : vector<32x64xf32>
    %c0_23 = arith.constant 0 : index
    %c4 = arith.constant 4 : index
    %c0_24 = arith.constant 0 : index
    %23 = vector.load %arg1[%c0_23, %c4, %c0_24] : memref<1x39x24xbf16, #tpu.memory_space<vmem>>, vector<1x32x24xbf16>
    %24 = vector.shape_cast %23 : vector<1x32x24xbf16> to vector<32x24xbf16>
    %c4_25 = arith.constant 4 : index
    %c0_26 = arith.constant 0 : index
    %c0_27 = arith.constant 0 : index
    %25 = vector.load %arg2[%c4_25, %c0_26, %c0_27] : memref<8x24x64xbf16, #tpu.memory_space<vmem>>, vector<1x24x64xbf16>
    %26 = vector.shape_cast %25 : vector<1x24x64xbf16> to vector<24x64xbf16>
    %cst_28 = arith.constant dense<0.000000e+00> : vector<32x64xf32>
    %27 = tpu.matmul %24, %26, %cst_28 {dimension_numbers = #tpu.dot_dimension_numbers<[1], [0], [0], [1], [0, 0, 1, 1], [], []>} : vector<32x24xbf16>, vector<24x64xbf16>, vector<32x64xf32> -> vector<32x64xf32>
    %28 = arith.addf %22, %27 : vector<32x64xf32>
    %c0_29 = arith.constant 0 : index
    %c5 = arith.constant 5 : index
    %c0_30 = arith.constant 0 : index
    %29 = vector.load %arg1[%c0_29, %c5, %c0_30] : memref<1x39x24xbf16, #tpu.memory_space<vmem>>, vector<1x32x24xbf16>
    %30 = vector.shape_cast %29 : vector<1x32x24xbf16> to vector<32x24xbf16>
    %c5_31 = arith.constant 5 : index
    %c0_32 = arith.constant 0 : index
    %c0_33 = arith.constant 0 : index
    %31 = vector.load %arg2[%c5_31, %c0_32, %c0_33] : memref<8x24x64xbf16, #tpu.memory_space<vmem>>, vector<1x24x64xbf16>
    %32 = vector.shape_cast %31 : vector<1x24x64xbf16> to vector<24x64xbf16>
    %cst_34 = arith.constant dense<0.000000e+00> : vector<32x64xf32>
    %33 = tpu.matmul %30, %32, %cst_34 {dimension_numbers = #tpu.dot_dimension_numbers<[1], [0], [0], [1], [0, 0, 1, 1], [], []>} : vector<32x24xbf16>, vector<24x64xbf16>, vector<32x64xf32> -> vector<32x64xf32>
    %34 = arith.addf %28, %33 : vector<32x64xf32>
    %c0_35 = arith.constant 0 : index
    %c6 = arith.constant 6 : index
    %c0_36 = arith.constant 0 : index
    %35 = vector.load %arg1[%c0_35, %c6, %c0_36] : memref<1x39x24xbf16, #tpu.memory_space<vmem>>, vector<1x32x24xbf16>
    %36 = vector.shape_cast %35 : vector<1x32x24xbf16> to vector<32x24xbf16>
    %c6_37 = arith.constant 6 : index
    %c0_38 = arith.constant 0 : index
    %c0_39 = arith.constant 0 : index
    %37 = vector.load %arg2[%c6_37, %c0_38, %c0_39] : memref<8x24x64xbf16, #tpu.memory_space<vmem>>, vector<1x24x64xbf16>
    %38 = vector.shape_cast %37 : vector<1x24x64xbf16> to vector<24x64xbf16>
    %cst_40 = arith.constant dense<0.000000e+00> : vector<32x64xf32>
    %39 = tpu.matmul %36, %38, %cst_40 {dimension_numbers = #tpu.dot_dimension_numbers<[1], [0], [0], [1], [0, 0, 1, 1], [], []>} : vector<32x24xbf16>, vector<24x64xbf16>, vector<32x64xf32> -> vector<32x64xf32>
    %40 = arith.addf %34, %39 : vector<32x64xf32>
    %c0_41 = arith.constant 0 : index
    %c7 = arith.constant 7 : index
    %c0_42 = arith.constant 0 : index
    %41 = vector.load %arg1[%c0_41, %c7, %c0_42] : memref<1x39x24xbf16, #tpu.memory_space<vmem>>, vector<1x32x24xbf16>
    %42 = vector.shape_cast %41 : vector<1x32x24xbf16> to vector<32x24xbf16>
    %c7_43 = arith.constant 7 : index
    %c0_44 = arith.constant 0 : index
    %c0_45 = arith.constant 0 : index
    %43 = vector.load %arg2[%c7_43, %c0_44, %c0_45] : memref<8x24x64xbf16, #tpu.memory_space<vmem>>, vector<1x24x64xbf16>
    %44 = vector.shape_cast %43 : vector<1x24x64xbf16> to vector<24x64xbf16>
    %cst_46 = arith.constant dense<0.000000e+00> : vector<32x64xf32>
    %45 = tpu.matmul %42, %44, %cst_46 {dimension_numbers = #tpu.dot_dimension_numbers<[1], [0], [0], [1], [0, 0, 1, 1], [], []>} : vector<32x24xbf16>, vector<24x64xbf16>, vector<32x64xf32> -> vector<32x64xf32>
    %46 = arith.addf %40, %45 : vector<32x64xf32>
    %c0_47 = arith.constant 0 : index
    %c0_48 = arith.constant 0 : index
    %47 = vector.load %arg3[%c0_47, %c0_48] : memref<1x64xf32, #tpu.memory_space<vmem>>, vector<1x64xf32>
    %48 = vector.broadcast %47 : vector<1x64xf32> to vector<32x64xf32>
    %49 = arith.addf %46, %48 : vector<32x64xf32>
    %cst_49 = arith.constant 0.000000e+00 : f32
    %50 = vector.broadcast %cst_49 : f32 to vector<32x64xf32>
    %51 = arith.maximumf %49, %50 : vector<32x64xf32>
    %52 = arith.truncf %51 : vector<32x64xf32> to vector<32x64xbf16>
    %c0_50 = arith.constant 0 : index
    %c0_51 = arith.constant 0 : index
    %c0_52 = arith.constant 0 : index
    %53 = vector.load %arg4[%c0_50, %c0_51, %c0_52] : memref<1x32x64xbf16, #tpu.memory_space<vmem>>, vector<1x32x64xbf16>
    %54 = vector.shape_cast %53 : vector<1x32x64xbf16> to vector<32x64xbf16>
    %55 = vector.shape_cast %52 : vector<32x64xbf16> to vector<1x32x64xbf16>
    tpu.vector_store %arg4[%c0_50, %c0_51, %c0_52], %55 {strides = array<i32>} : memref<1x32x64xbf16, #tpu.memory_space<vmem>>, vector<1x32x64xbf16>,
    return
  }
  func.func @transform_0(%arg0: i32) -> (i32, i32, i32) {
    %c0_i32 = arith.constant 0 : i32
    %c0_i32_0 = arith.constant 0 : i32
    %c0_i32_1 = arith.constant 0 : i32
    return %arg0, %c0_i32, %c0_i32_0 : i32, i32, i32
  }
  func.func @transform_1(%arg0: i32) -> (i32, i32, i32) {
    %c0_i32 = arith.constant 0 : i32
    %c0_i32_0 = arith.constant 0 : i32
    %c0_i32_1 = arith.constant 0 : i32
    %c0_i32_2 = arith.constant 0 : i32
    return %c0_i32, %c0_i32_0, %c0_i32_1 : i32, i32, i32
  }
  func.func @transform_2(%arg0: i32) -> (i32, i32) {
    %c0_i32 = arith.constant 0 : i32
    %c0_i32_0 = arith.constant 0 : i32
    %c0_i32_1 = arith.constant 0 : i32
    return %c0_i32, %c0_i32_0 : i32, i32
  }
  func.func @transform_3(%arg0: i32) -> (i32, i32, i32) {
    %c0_i32 = arith.constant 0 : i32
    %c0_i32_0 = arith.constant 0 : i32
    %c0_i32_1 = arith.constant 0 : i32
    return %arg0, %c0_i32, %c0_i32_0 : i32, i32, i32
  }
}

</mosaic_0001>

<bundles_post_ra>
// kernel: tpu_custom_call.1
= control target key start
LH: loop header
LB: loop body
LE: loop exit
PB: predicated region body
PF: predicated region fallthrough
CT: control target
= control target key end

     0   :  { %8 = vsyncpa [#allocation3], 0  ;;  %s1692_s0 = inlined_call_operand.vmem [shape: bf16[2,39,24], index: 0, kind: input, shape index: {}]   ;;  %s1693_s1 = inlined_call_operand.hbm [shape: bf16[8,24,64], index: 1, kind: input, shape index: {}]   ;;  %s1694_s2 = inlined_call_operand.vmem [shape: f32[1,64], index: 2, kind: input, shape index: {}]   ;;  %s1695_s3 = inlined_call_operand.hbm [shape: bf16[2,32,64], index: 3, kind: output, shape index: {}]  }
   0x1   :  { %9 = vsyncpa [#allocation4], 0 }
   0x2   :  { %11 = vsyncpa [#allocation4 + $0x1], 0  ;;  %s1445_s12 = smov 0   ;;  %s1447_s13 = smov 0  }
   0x3   :  { %s1449_s14 = smov 0   ;;  %s1451_s15 = smov 0  }
   0x4 LB: > { %s1466_s16 = sadd.s32 4294967295, %s1417_s15   ;;  %s1047_s17 = sadd.s32 4294967294, %s1417_s15   ;;  %s1417_s15 = sphi %s1451_s15, %s1711_s15   ;;  %s1413_s14 = sphi %s1449_s14, %s1710_s14   ;;  %s1409_s13 = sphi %s1447_s13, %s1709_s13   ;;  %s1405_s12 = sphi %s1445_s12, %s1708_s12  }
   0x5   : > { %s1470_s18 = sadd.s32 1, %s1417_s15   ;;  %s92_s19 = sadd.s32 1, %s1413_s14 }
   0x6   : > { %s89_s20 = ssub.s32 %s1417_s15, %s1470_s18  ;;  %p102_p0 = scmp.ne.s32.totalorder %s1413_s14, %s1409_s13 }
   0x7   : > { %p90_p1 = scmp.eq.s32.totalorder %s89_s20, 0  ;;  %p103_p2 = scmp.eq.s32.totalorder %s1466_s16, 1 }
   0x8   : > { %p108_p3 = scmp.ne.s32.totalorder %s1409_s13, %s1405_s12  ;;  %p109_p4 = scmp.eq.s32.totalorder %s1047_s17, 1 }
   0x9   : > { %s1481_s21 = scalar_select %p90_p1, %s1413_s14, %s92_s19  }
   0xa   : > { %p1483_p5 = por %p103_p2, %p102_p0  ;;  %p1487_p6 = por %p109_p4, %p108_p3 }
   0xb   : > { %p1048_p7 = scmp.ge.s32.totalorder %s1417_s15, 1  ;;  %p116_p8 = scmp.lt.s32.totalorder %s1417_s15, 3 }
   0xc   : > { %s1699_s22 = scalar_select %p1483_p5, 1, 0 }
   0xd   : > { %s1700_s23 = scalar_select %p1487_p6, 1, 0 }
   0xe   : > { %p1696_p9 = scmp.eq.s32.totalorder %s1466_s16, 0  ;;  %p1494_p10 = pnand %p1048_p7, %p116_p8 }
   0xf   : > { %s1419_s25 = smov [#allocation2]   ;;  %s1323_s30 = scalar_lea.hbm %s1693_s1, 1536 }
  0x10   : > { %s1701_s24 = scalar_select %p1494_p10, 1, 0 }
  0x11   : > { %s128_s26 = sshll.u32 %s1419_s25, 4  ;;  %p1250_p11 = pneg %p1494_p10  ;;  %s129_s26 = int_to_ptr.vmem [resolvable:$true] %s128_s26 }
  0x12   : > { %p1324_p13 = scmp.ne.s32.totalorder %s1693_s1, %s1323_s30  ;;  %p1330_p3 = scmp.lt.u32.totalorder %s1323_s30, %s1693_s1 }
  0x13   : > { %p1502_p12 = pnand %p1696_p9, %p1250_p11 }
  0x15   : > { %p1325_p0 = pneg %p1502_p12 }
  0x17   : > { %p1326_p1 = pnand %p1325_p0, %p1324_p13 }
  0x19   : > { %p1327_p2 = pneg %p1326_p1 }
  0x1b   : > { %p1332_p4 = pnand %p1330_p3, %p1327_p2 }
  0x1d   : > { %1335 = shalt.err (!%p1332_p4)
}
  0x1e   : > { %s1336_s8 = scalar_lea.vmem %s129_s26, 1536  ;;  %p1344_p9 = scmp.lt.s32.totalorder %s129_s26, %s129_s26 }
  0x1f   : > { %p1337_p7 = scmp.ne.s32.totalorder %s129_s26, %s1336_s8  ;;  %p1345_p6 = scmp.lt.s32.totalorder %s1336_s8, %s1336_s8 }
  0x21   : > { %p1339_p8 = pnand %p1337_p7, %p1325_p0  ;;  %p1346_p5 = por %p1345_p6, %p1344_p9 }
  0x23   : > { %p1340_p11 = pneg %p1339_p8 }
  0x25   : > { %p1347_p10 = pnand %p1346_p5, %p1340_p11 }
  0x27   : > { %1350 = shalt.err (!%p1347_p10)
}
  0x28   : > { %s1420_s9 = smov 64   ;;  %s1421_s10 = smov 4  }
  0x29   : > { %1253 = dma.hbm_to_vmem [thread:$0]  (!%p1502_p12), %s1693_s1, 1536, %s129_s26, [#allocation3], %s1420_s9, %s1420_s9, %s1421_s10  }
  0x2a   : > { %p1703_p13 = scmp.ne.s32.totalorder %s1701_s24, 0 }
  0x2b   : > { %p1704_p1 = scmp.eq.s32.totalorder (!%p1703_p13), %s1466_s16, 0 }
  0x2c   : > { %155 = sbr.rel (%p1703_p13) target bundleno = 344 (0x158), region = 32 }
  0x33   : > { %1396 = dma.done.wait (%p1704_p1), [#allocation3], 1536   ;;  %p1705_p0 = pmov %p1704_p1 }
  0x34   : > { %p179_p5 = scmp.lt.s32.totalorder %s1466_s16, 1  ;;  %v1298_v0 = vld [vmem:[#allocation2 + $0xc] sm:$0xff]   ;;  %vm247_vm0 = vcmask 1043456   ;;  %vm210_vm1 = vsmask.f32 7424  ;;  %vm240_vm2 = vcmask 195584  }
  0x35   : > { %1398 = vsyncadd (%p1705_p0), [#allocation3], 4294965760  ;;  %v1299_v1 = vld [vmem:[#allocation2 + $0x30] sm:$0xff]   ;;  %vm559_vm3 = vcmask 1045504   ;;  %1143 = vmatprep.subr.bf16.mxu1 %v1298_v0  ;;  %v1301_v3 = vld [vmem:[#allocation2 + $0x38] ss:$0 sps:$4 sm:$0xff]  }
  0x36   : > { %s180_s19 = scalar_select %p179_p5, %s1466_s16, 1  ;;  %v1300_v2 = vld [vmem:[#allocation2 + $0x14] ss:$0 sps:$4 sm:$0xff]   ;;  %1175 = vmatprep.subr.bf16.mxu0 %v1299_v1  ;;  %1144 = vmatpush3.bf16.msra.mxu1 %v1298_v0  ;;  %v581_v9 = vsel %vm247_vm0, %v1301_v3, 0  ;;  %v1306_v11 = vld [vmem:[#allocation2] sm:$0xff]   ;;  %v1311_v46 = vld [vmem:[#allocation2 + $0x18] sm:$0xff]  }
  0x37   : > { %1176 = vmatpush3.bf16.msra.mxu0 %v1299_v1  ;;  %1235 = vmatprep.subr.msk.bf16.mxu1 %vm247_vm0, %v1300_v2  ;;  %v249_v6 = vsel %vm247_vm0, %v1300_v2, 0  ;;  %v1308_v24 = vld [vmem:[#allocation2 + $0x3c] sm:$0xff]   ;;  %v1309_v27 = vld [vmem:[#allocation2 + $0x8] ss:$0 sps:$4 sm:$0xff]   ;;  %v1310_v31 = vld [vmem:[#allocation2 + $0x44] ss:$0 sps:$4 sm:$0xff]  }
  0x38   : > { %s1243_s20 = smul.u32 20, %s180_s19  ;;  %1239 = vmatprep.subr.msk.bf16.mxu0 %vm247_vm0, %v1301_v3  ;;  %vm644_vm4 = vsmask.f32 5376  ;;  %v314_v42 = vsel %vm247_vm0, %v1309_v27, 0  ;;  %v682_v43 = vsel %vm247_vm0, %v1310_v31, 0  ;;  %v1313_v49 = vld [vmem:[#allocation2 + $0x48] sm:$0xff]  }
  0x39   : > { %vm373_vm5 = vcmask 1046528   ;;  %vm745_vm6 = vcmask 1044480   ;;  %v1314_v63 = vld [vmem:[#allocation2 + $0x20] ss:$0 sps:$4 sm:$0xff]   ;;  %v1315_v0 = vld [vmem:[#allocation2 + $0x50] ss:$0 sps:$4 sm:$0xff]  }
  0x3a   : > { %s1533_s26 = scalar_lea.vmem %s1692_s0, %s1243_s20  ;;  %1146 = vmatpush3.bf16.msra.mxu1 %v249_v6  ;;  %vm458_vm7 = vsmask.f32 6400  ;;  %vm830_vm8 = vsmask.f32 4352  ;;  %s176_s24 = sand.u32 1, %s1409_s13   ;;  %vm954_vm9 = vcmask 519168  }
  0x3b   : > { %v185_v4 = vld [vmem:[%s1533_s26] sm:$0xf]  ;;  %v1537_v5 = vld [vmem:[%s1533_s26 + $0x4] sm:$0xf]  ;;  %v1543_v8 = vld [vmem:[%s1533_s26 + $0x8] sm:$0xff]   ;;  %1178 = vmatpush3.bf16.msra.mxu0 %v581_v9  ;;  %1151 = vmatprep.subr.bf16.mxu1 %v1306_v11  ;;  %v767_v9 = vsel %vm247_vm0, %v1315_v0, 0 }
  0x3c   : > { %v1055_v7 = vcombine.low %v185_v4, %v1537_v5  ;;  %v551_v10 = vld [vmem:[%s1533_s26] sm:$0xc]  ;;  %v1549_v14 = vshll.u32 %v1543_v8, 16  ;;  %v1552_v15 = vshrl.u32 %v1543_v8, 16  ;;  %v561_v17 = vrot.slane %v1543_v8, 2  ;;  %1183 = vmatprep.subr.bf16.mxu0 %v1308_v24  ;;  %s1053_s30 = sshll.u32 %s176_s24, 4 }
  0x3d   : > { %v1076_v16 = vcombine.low %v551_v10, %v1537_v5  ;;  %v1557_v18 = vld [vmem:[%s1533_s26 + $0x10] ss:$0 sps:$4 sm:$0x11]   ;;  %v365_v50 = vld [vmem:[%s1533_s26] sm:$0xe]  ;;  %v375_v59 = vrot.slane %v1543_v8, 1 }
  0x3e   : > { %v212_v12 = vshrl.u32 %v1055_v7, 16  ;;  %v214_v13 = vshll.u32 %v1055_v7, 16  ;;  %v221_v20 = vrot.slane %v1549_v14, 1  ;;  %v227_v22 = vshll.u32 %v1557_v18, 16  ;;  %v737_v54 = vld [vmem:[%s1533_s26] sm:$0x8] }
  0x3f   : > { %v560_v21 = vrot.slane %v1076_v16, 2  ;;  %v1562_v23 = vld [vmem:[%s1533_s26 + $0x10] ss:$0 sps:$4 sm:$0x33]   ;;  %v646_v33 = vshrl.u32 %v1076_v16, 16  ;;  %v649_v34 = vshll.u32 %v1076_v16, 16  ;;  %v1066_v55 = vcombine.low %v365_v50, %v1537_v5 }
  0x40   : > { %v216_v19 = vrot.slane %v214_v13, 1  ;;  %v225_v26 = vor.u32 %v1552_v15, %v221_v20  ;;  %v229_v29 = vrot.slane %v227_v22, 1  ;;  %v563_v30 = vrot.slane %v1562_v23, 2  ;;  %v1577_v41 = vld [vmem:[%s1533_s26 + $0x10] ss:$0 sps:$4 sm:$0x77]  }
  0x41   : > { %v562_v28 = vsel %vm559_vm3, %v560_v21, %v561_v17  ;;  %v653_v37 = vrot.slane %v1552_v15, 2  ;;  %v648_v38 = vrot.slane %v646_v33, 2  ;;  %v651_v39 = vrot.slane %v649_v34, 3  ;;  %v1318_v10 = vld [vmem:[#allocation2 + $0x24] sm:$0xff]   ;;  %v1320_v33 = vld [vmem:[#allocation2 + $0x2c] ss:$0 sps:$4 sm:$0xff]  }
  0x42   : > { %v217_v25 = vor.u32 %v216_v19, %v212_v12  ;;  %1179 = vmatprep.mubr.msk.bf16.mxu0 %vm240_vm2, %v562_v28  ;;  %v230_v35 = vsel %vm210_vm1, %v225_v26, %v229_v29  ;;  %v564_v36 = vsel %vm559_vm3, %v561_v17, %v563_v30  ;;  %v654_v40 = vrot.slane %v1549_v14, 3  ;;  %v1319_v12 = vld [vmem:[#allocation2 + $0x54] sm:$0xff]   ;;  %v1321_v34 = vld [vmem:[#allocation2 + $0x5c] ss:$0 sps:$4 sm:$0xff]   ;;  %s178_s4 = scalar_lea.vmem [#allocation5], %s1053_s30  ;;  %s1110_s6 = sshll.u32 %s1466_s16, 8 }
  0x43   : > { %1180 = vmatmul.mubr.msk.bf16.vlgmr.msra.gmra.mrb[0].mxu0 %vm240_vm2, %v564_v36  ;;  %v652_v44 = vor.u32 %v651_v39, %v648_v38  ;;  %v658_v47 = vshrl.u32 %v1577_v41, 16  ;;  %v661_v48 = vshll.u32 %v1577_v41, 16  ;;  %v1086_v56 = vcombine.low %v737_v54, %v1537_v5  ;;  %s973_s5 = sshll.u32 %s178_s4, 4  ;;  %s1645_s9 = scalar_lea.hbm %s1695_s3, %s1110_s6  ;;  %s1639_s5 = int_to_ptr.vmem [resolvable:$true] %s973_s5 }
  0x44   : > { %v222_v32 = vsel %vm210_vm1, %v217_v25, %v221_v20  ;;  %1184 = vmatpush3.bf16.msra.mxu0 %v1308_v24  ;;  %v655_v45 = vor.u32 %v654_v40, %v653_v37  ;;  %v374_v58 = vrot.slane %v1066_v55, 1  ;;  %v747_v61 = vrot.slane %v1543_v8, 3  ;;  %v1322_v24 = vld [vmem:[%s1533_s26 + $0x10] ss:$0 sps:$4 sm:$0xff]   ;;  %s1651_s16 = scalar_lea.sflag [#allocation4], %s176_s24  ;;  %s1351_s10 = scalar_lea.vmem %s1639_s5, 256 }
  0x45   : > { %1147 = vmatprep.mubr.msk.bf16.mxu1 %vm240_vm2, %v222_v32  ;;  %1240 = vmatprep.subr.msk.bf16.mxu0 %vm247_vm0, %v1310_v31  ;;  %v660_v52 = vrot.slane %v658_v47, 2  ;;  %v663_v53 = vrot.slane %v661_v48, 3  ;;  %v746_v60 = vrot.slane %v1086_v56, 3  ;;  %v460_v1 = vshrl.u32 %v1066_v55, 16  ;;  %v1096_v48 = vld [vmem:[%s1694_s2] ss:$0 sm:$0xff]  ;;  %p1352_p6 = scmp.ne.s32.totalorder %s1639_s5, %s1351_s10 }
  0x46   : > { %1148 = vmatmul.mubr.msk.bf16.vlgmr.msra.gmra.mrb[0].mxu1 %vm240_vm2, %v230_v35  ;;  %v656_v51 = vsel %vm644_vm4, %v652_v44, %v655_v45  ;;  %v463_v2 = vshll.u32 %v1066_v55, 16  ;;  %v376_v3 = vsel %vm373_vm5, %v374_v58, %v375_v59  ;;  %v832_v5 = vshrl.u32 %v1086_v56, 16  ;;  %p1706_p9 = scmp.ne.s32.totalorder %s1699_s22, 0  ;;  %s1422_s11 = smov [#allocation5]  }
  0x47   : > { %1152 = vmatpush3.bf16.msra.mxu1 %v1306_v11  ;;  %1155 = vmatprep.mubr.msk.bf16.mxu1 %vm240_vm2, %v1055_v7  ;;  %v664_v57 = vor.u32 %v663_v53, %v660_v52  ;;  %v748_v4 = vsel %vm745_vm6, %v746_v60, %v747_v61  ;;  %v835_v6 = vshll.u32 %v1086_v56, 16  ;;  %v395_v7 = vsel %vm247_vm0, %v1314_v63, 0  ;;  %s1355_s17 = sshll.u32 %s1422_s11, 4  ;;  %s1356_s17 = int_to_ptr.vmem [resolvable:$false] %s1355_s17 }
  0x48   : > { %1236 = vmatprep.subr.msk.bf16.mxu1 %vm247_vm0, %v1309_v27  ;;  %1186 = vmatpush3.bf16.msra.mxu0 %v682_v43  ;;  %v749_v11 = vrot.slane %v1577_v41, 3  ;;  %v462_v13 = vrot.slane %v460_v1, 1  ;;  %v465_v16 = vrot.slane %v463_v2, 2  ;;  %v467_v17 = vrot.slane %v1552_v15, 1  ;;  %p1353_p10 = pnand %p1352_p6, %p1706_p9  ;;  %s1357_s19 = scalar_lea.vmem %s1356_s17, 512 }
  0x49   : > { %1187 = vmatprep.mubr.msk.bf16.mxu0 %vm240_vm2, %v656_v51  ;;  %1191 = vmatprep.subr.bf16.mxu0 %v1313_v49  ;;  %v665_v62 = vsel %vm644_vm4, %v655_v45, %v664_v57  ;;  %v468_v19 = vrot.slane %v1549_v14, 2  ;;  %v834_v20 = vrot.slane %v832_v5, 3  ;;  %v837_v21 = vrot.slane %v835_v6, 4  ;;  %p1358_p2 = scmp.lt.s32.totalorder %s1639_s5, %s1356_s17  ;;  %p1359_p3 = scmp.lt.s32.totalorder %s1357_s19, %s1351_s10 }
  0x4a   : > { %v839_v22 = vrot.slane %v1552_v15, 3  ;;  %v750_v26 = vsel %vm745_vm6, %v747_v61, %v749_v11  ;;  %v466_v27 = vor.u32 %v465_v16, %v462_v13  ;;  %v472_v31 = vshrl.u32 %v1562_v23, 16  ;;  %p1354_p12 = pneg %p1353_p10 }
  0x4b   : > { %1154 = vmatpush3.bf16.msra.mxu1 %v314_v42  ;;  %v469_v28 = vor.u32 %v468_v19, %v467_v17  ;;  %v838_v29 = vor.u32 %v837_v21, %v834_v20  ;;  %v475_v15 = vshll.u32 %v1562_v23, 16  ;;  %v847_v32 = vshll.u32 %v1322_v24, 16  ;;  %p1360_p4 = por %p1359_p3, %p1358_p2 }
  0x4c   : > { %1159 = vmatprep.subr.bf16.mxu1 %v1311_v46  ;;  %v474_v37 = vrot.slane %v472_v31, 1  ;;  %v496_v23 = vsel %vm247_vm0, %v1320_v33, 0  ;;  %v868_v41 = vsel %vm247_vm0, %v1321_v34, 0 }
  0x4d   : > { %v470_v35 = vsel %vm458_vm7, %v466_v27, %v469_v28  ;;  %v477_v38 = vrot.slane %v475_v15, 2  ;;  %v849_v40 = vrot.slane %v847_v32, 4  ;;  %p1361_p7 = pnand %p1360_p4, %p1354_p12 }
  0x4f   : > { %1188 = vmatmul.mubr.msk.bf16.vlgmr.msra.gmra.mrb[0].mxu0 %vm240_vm2, %v665_v62  ;;  %v478_v42 = vor.u32 %v477_v38, %v474_v37 }
  0x50   : > { %1192 = vmatpush3.bf16.msra.mxu0 %v1313_v49  ;;  %1195 = vmatprep.mubr.msk.bf16.mxu0 %vm240_vm2, %v748_v4 }
  0x51   : > { %1241 = vmatprep.subr.msk.bf16.mxu0 %vm247_vm0, %v1315_v0  ;;  %v479_v44 = vsel %vm458_vm7, %v469_v28, %v478_v42 }
  0x52   : > { %1156 = vmatmul.mubr.msk.bf16.vlgmr.msra.gmra.mrb[0].mxu1 %vm240_vm2, %v1543_v8  ;;  %v377_v8 = vrot.slane %v1557_v18, 1  ;;  %v840_v18 = vrot.slane %v1549_v14, 4  ;;  %v844_v14 = vshrl.u32 %v1322_v24, 16 }
  0x53   : > { %1160 = vmatpush3.bf16.msra.mxu1 %v1311_v46  ;;  %1163 = vmatprep.mubr.msk.bf16.mxu1 %vm240_vm2, %v376_v3 }
  0x54   : > { %1237 = vmatprep.subr.msk.bf16.mxu1 %vm247_vm0, %v1314_v63  ;;  %1194 = vmatpush3.bf16.msra.mxu0 %v767_v9  ;;  %v378_v25 = vsel %vm373_vm5, %v375_v59, %v377_v8  ;;  %v841_v30 = vor.u32 %v840_v18, %v839_v22  ;;  %v846_v39 = vrot.slane %v844_v14, 3 }
  0x55   : > { %1199 = vmatprep.subr.bf16.mxu0 %v1319_v12 }
  0x56   : > { %v842_v36 = vsel %vm830_vm8, %v838_v29, %v841_v30  ;;  %v850_v43 = vor.u32 %v849_v40, %v846_v39 }
  0x57   : > { %1162 = vmatpush3.bf16.msra.mxu1 %v395_v7 }
  0x58   : > { %1167 = vmatprep.subr.bf16.mxu1 %v1318_v10  ;;  %v851_v45 = vsel %vm830_vm8, %v841_v30, %v850_v43 }
  0x5b   : > { %1196 = vmatmul.mubr.msk.bf16.vlgmr.msra.gmra.mrb[0].mxu0 %vm240_vm2, %v750_v26 }
  0x5c   : > { %1200 = vmatpush3.bf16.msra.mxu0 %v1319_v12  ;;  %1203 = vmatprep.mubr.msk.bf16.mxu0 %vm240_vm2, %v842_v36 }
  0x5d   : > { %1242 = vmatprep.subr.msk.bf16.mxu0 %vm247_vm0, %v1321_v34 }
  0x5e   : > { %1164 = vmatmul.mubr.msk.bf16.vlgmr.msra.gmra.mrb[0].mxu1 %vm240_vm2, %v378_v25 }
  0x5f   : > { %1168 = vmatpush3.bf16.msra.mxu1 %v1318_v10  ;;  %1171 = vmatprep.mubr.msk.bf16.mxu1 %vm240_vm2, %v470_v35 }
  0x60   : > { %1238 = vmatprep.subr.msk.bf16.mxu1 %vm247_vm0, %v1320_v33  ;;  %1202 = vmatpush3.bf16.msra.mxu0 %v868_v41 }
  0x63   : > { %1170 = vmatpush3.bf16.msra.mxu1 %v496_v23 }
  0x67   : > { %1204 = vmatmul.mubr.msk.bf16.vlgmr.msra.gmra.mrb[0].mxu0 %vm240_vm2, %v851_v45 }
  0x6a   : > { %1172 = vmatmul.mubr.msk.bf16.vlgmr.msra.gmra.mrb[0].mxu1 %vm240_vm2, %v479_v44 }
 0x13a   : > { %v1205_v47 = vpop.f32.mrb[0].mxu0 }
 0x13b   : > { %v904_v51 = vpop.f32.mrb[1].mxu0 }
 0x13c   : > { %v1206_v54 = vpop.f32.mrb[2].mxu0 }
 0x13d   : > { %v1173_v46 = vpop.f32.mrb[0].mxu1  ;;  %v907_v58 = vpop.f32.mrb[3].mxu0 }
 0x13e   : > { %v1207_v49 = vadd.f32 %v1205_v47, %v1173_v46  ;;  %v532_v50 = vpop.f32.mrb[1].mxu1 }
 0x13f   : > { %v1208_v52 = vadd.f32 %v904_v51, %v532_v50  ;;  %v1174_v53 = vpop.f32.mrb[2].mxu1 }
 0x140   : > { %v932_v55 = vadd.f32 %v1207_v49, %v1096_v48  ;;  %v1209_v56 = vadd.f32 %v1206_v54, %v1174_v53  ;;  %v535_v57 = vpop.f32.mrb[3].mxu1 }
 0x141   : > { %v930_v59 = vadd.f32 %v1208_v52, %v1096_v48  ;;  %v1210_v60 = vadd.f32 %v907_v58, %v535_v57 }
 0x142   : > { %v936_v61 = vmax.f32 %v932_v55, 0.0  ;;  %v933_v62 = vadd.f32 %v1209_v56, %v1096_v48 }
 0x143   : > { %v934_v63 = vmax.f32 %v930_v59, 0.0  ;;  %v931_v0 = vadd.f32 %v1210_v60, %v1096_v48 }
 0x144   : > { %v1108_v1 = vpack.c.bf16 %v936_v61, %v936_v61  ;;  %v937_v2 = vmax.f32 %v933_v62, 0.0 }
 0x145   : > { %v1106_v3 = vpack.c.bf16 %v934_v63, %v934_v63  ;;  %v935_v4 = vmax.f32 %v931_v0, 0.0 }
 0x146   : > { %957 = vst.msk [vmem:[%s178_s4 + $0x8] sm:$0xf] %vm954_vm9, %v1108_v1  ;;  %v1109_v5 = vpack.c.bf16 %v937_v2, %v937_v2 }
 0x147   : > { %955 = vst.msk [vmem:[%s178_s4] sm:$0xf] %vm954_vm9, %v1106_v3  ;;  %v1107_v6 = vpack.c.bf16 %v935_v4, %v935_v4 }
 0x148   : > { %958 = vst.msk [vmem:[%s178_s4 + $0xc] sm:$0xf] %vm954_vm9, %v1109_v5 }
 0x149   : > { %956 = vst.msk [vmem:[%s178_s4 + $0x4] sm:$0xf] %vm954_vm9, %v1107_v6 }
 0x14a   : > { %1364 = shalt.err (!%p1361_p7)
}
 0x14b   : > { %s1365_s20 = scalar_lea.hbm %s1645_s9, 256  ;;  %s1369_s26 = scalar_lea.hbm %s1695_s3, 512 }
 0x14c   : > { %p1366_p8 = scmp.ne.s32.totalorder %s1645_s9, %s1365_s20  ;;  %p1370_p1 = scmp.lt.u32.totalorder %s1645_s9, %s1695_s3 }
 0x14d   : > { %p1371_p0 = scmp.lt.u32.totalorder %s1369_s26, %s1365_s20  ;;  %p1373_p6 = scmp.lt.u32.totalorder %s1365_s20, %s1645_s9 }
 0x14e   : > { %p1367_p11 = pnand %p1366_p8, %p1706_p9 }
 0x14f   : > { %p1372_p5 = por %p1371_p0, %p1370_p1 }
 0x150   : > { %p1368_p13 = pneg %p1367_p11 }
 0x151   : > { %p1374_p10 = por %p1373_p6, %p1372_p5 }
 0x153   : > { %p1375_p12 = pnand %p1374_p10, %p1368_p13 }
 0x155   : > { %1378 = shalt.err (!%p1375_p12)
}
 0x156   : > { %s1423_s29 = smov 64   ;;  %s1424_s30 = smov 4  }
 0x157   : > { %1248 = dma.vmem_to_hbm [thread:$0]  (%p1706_p9), %s1639_s5, 256, %s1645_s9, %s1651_s16, %s1423_s29, %s1423_s29, %s1424_s30  }
 0x158 PF: > { %p1260_p2 = scmp.ge.s32.totalorder %s1417_s15, 2  ;;  %s988_s4 = sand.u32 1, %s1405_s12  }
 0x159   : > { %p1707_p3 = scmp.ne.s32.totalorder %s1700_s23, 0  ;;  %s989_s6 = scalar_lea.sflag [#allocation4], %s988_s4 }
 0x15b   : > { %p1255_p4 = pnand %p1260_p2, %p1707_p3 }
 0x15d   : > { %1400 = dma.done.wait (!%p1255_p4), %s989_s6, 256  }
 0x15e   : > { %1402 = vsyncadd (!%p1255_p4), %s989_s6, 4294967040  ;;  %p14_p7 = scmp.ge.s32.totalorder %s1470_s18, 4   ;;  %s1708_s12 = smov %s1409_s13 }
 0x15f   : > { %s1709_s13 = smov %s1413_s14  ;;  %s1710_s14 = smov %s1481_s21 }
 0x160   : > { %s1711_s15 = smov %s1470_s18  ;;  %16 = sbr.rel (!%p14_p7) target bundleno = 4 (0x4), region = 79 }
 0x167   :  { %994 = vsyncpa [#allocation3], 1 }
 0x168   :  { %996 = vsyncpa [#allocation3 + $0x1], 1 }
 0x169   :  { %997 = vsyncpa [#allocation4], 1 }
 0x16a   :  { %999 = vsyncpa [#allocation4 + $0x1], 1 }

</bundles_post_ra>
